<compile_context>
chip_gen: v6e
topology: v6e:2x2x1
jax: 0.10.0
libtpu: 0.0.40
codegen_flags: <defaults>
</compile_context>

<pallas_src>
import jax
import jax.numpy as jnp
from jax.experimental import pallas as pl
from jax.experimental.pallas import tpu as pltpu


def _round_up(x: int, m: int) -> int:
    return ((x + m - 1) // m) * m


def _largest_tile(total: int, granule: int, cap: int) -> int:
    """Largest divisor of `total` that is a multiple of `granule` and <= cap.

    `total` must itself be a multiple of `granule`, so `granule` is always a
    valid fallback."""
    cap = max(min(cap, total), granule)
    t = cap - (cap % granule)
    while t > granule:
        if total % t == 0:
            return t
        t -= granule
    return granule


def _lars_kernel(x_ref, w_ref, out_ref):
    # x_ref:   (tile_n, P)        sample tile
    # w_ref:   (P, tile_oc)       packed-dag weight tile
    # out_ref: (tile_n, tile_oc)  lane-dense reconstruction tile (written once)
    out_ref[...] = jnp.dot(
        x_ref[...], w_ref[...], preferred_element_type=jnp.float32
    ).astype(out_ref.dtype)


def _lars_kernel_ktiled(x_ref, w_ref, out_ref, acc_ref):
    # Same as above but with the contraction (d) tiled on the trailing grid axis.
    k = pl.program_id(2)

    @pl.when(k == 0)
    def _():
        acc_ref[...] = jnp.zeros_like(acc_ref)

    acc_ref[...] += jnp.dot(
        x_ref[...], w_ref[...], preferred_element_type=jnp.float32
    )

    @pl.when(k == pl.num_programs(2) - 1)
    def _():
        out_ref[...] = acc_ref[...].astype(out_ref.dtype)


def lars_forward(
    X,
    W,
    *,
    tile_n=512,
    tile_oc=1024,
    tile_k=512,
    output_layout="onc",
    min_out_bytes=256 * 1024,
    vmem_budget_bytes=40 * 1024 * 1024,
):
    """Pallas implementation of LARSAlgorithm.forward(X, dags).

    Returns (reconstructed_X, W != 0, 0.0).  With output_layout="onc" (default)
    the reconstruction is (O, N, C) exactly like the PyTorch module; "noc"
    returns (N, O, C) and skips the HBM relayout.  The reconstruction is float32
    (MXU accumulation precision) regardless of input dtype.
    """
    N, P = X.shape
    O, P2, C = W.shape
    assert P == P2, "W must be (num_dags, d, d) with d == X.shape[1]"
    assert output_layout in ("onc", "noc")
    OC = O * C

    out_dtype = jnp.float32
    itemsize_out = jnp.dtype(out_dtype).itemsize

    # (W != 0) is tiny (O*d*d) -> plain XLA; keeps the kernel single-output and
    # both grid axes "parallel".
    dag_mask = W != 0
    regularizer = 0.0

    n_pad = _round_up(N, 8)
    oc_pad = _round_up(OC, 128)

    # Writeback-bound op: gate tiny problems on output bytes, not FLOPs.
    if n_pad * oc_pad * itemsize_out < min_out_bytes:
        eq = "np,opc->onc" if output_layout == "onc" else "np,opc->noc"
        recon = jnp.einsum(eq, X.astype(out_dtype), W.astype(out_dtype))
        return recon, dag_mask, regularizer

    # MXU input precision: native bf16 if both operands are bf16, else f32.
    if X.dtype == jnp.bfloat16 and W.dtype == jnp.bfloat16:
        mm_dtype = jnp.bfloat16
    else:
        mm_dtype = jnp.float32
    in_item = jnp.dtype(mm_dtype).itemsize

    # K(=d) handling: full-depth block while small; tiled + accumulator when large.
    if P > 1024:
        tile_k = _round_up(min(tile_k, 512), 128)
        p_pad = _round_up(P, tile_k)
    else:
        tile_k = P  # full extent -> legal block dim even when P isn't 128-aligned
        p_pad = P
    multi_k = (p_pad // tile_k) > 1

    # Lane packing (layout plumbing).  If W is reused across many calls, the
    # caller should hoist/pre-pack this once outside the per-step path.
    X_mm = X.astype(mm_dtype)
    W_packed = jnp.transpose(W, (1, 0, 2)).reshape(P, OC).astype(mm_dtype)
    if n_pad != N:
        X_mm = jnp.pad(X_mm, ((0, n_pad - N), (0, 0)))
    if p_pad != P:
        X_mm = jnp.pad(X_mm, ((0, 0), (0, p_pad - P)))
        W_packed = jnp.pad(W_packed, ((0, p_pad - P), (0, 0)))
    if oc_pad != OC:
        W_packed = jnp.pad(W_packed, ((0, 0), (0, oc_pad - OC)))

    # Tiles are divisors of the hardware-granule padded sizes -> no tile padding.
    tile_n = _largest_tile(n_pad, 8, tile_n)
    tile_oc = _largest_tile(oc_pad, 128, tile_oc)

    # Guarantee >= 2 tiles on a parallel axis so both v7x TensorCores get work
    # (a no-op on single-TC v5e/v6e).
    if (n_pad // tile_n) * (oc_pad // tile_oc) == 1:
        if oc_pad >= 256:
            tile_oc = _largest_tile(oc_pad, 128, oc_pad // 2)
        elif n_pad >= 16:
            tile_n = _largest_tile(n_pad, 8, n_pad // 2)

    def footprint(tn, toc, tk):
        # Double-buffered X / W / out tiles (the 2x W buffer is counted even
        # though W only changes on the outer axis), plus the f32 accumulator.
        x_b = tn * max(tk, 128) * in_item        # X tile, lane-padded to 128
        w_b = _round_up(tk, 8) * toc * in_item
        o_b = tn * toc * itemsize_out
        acc_b = tn * toc * 4 if multi_k else 0
        return 2 * (x_b + w_b + o_b) + acc_b

    # Shrink tiles until the footprint fits the budget (conservative for v7x's
    # 64 MiB/core VMEM; roomy on v5e/v6e's 128 MiB).
    while footprint(tile_n, tile_oc, tile_k) > vmem_budget_bytes:
        if tile_oc > 128:
            tile_oc = _largest_tile(oc_pad, 128, tile_oc // 2)
        elif tile_n > 8:
            tile_n = _largest_tile(n_pad, 8, tile_n // 2)
        else:
            break

    vmem_limit = int(
        min(max(2 * footprint(tile_n, tile_oc, tile_k), 32 << 20), 48 << 20)
    )

    cost = pl.CostEstimate(
        flops=2 * n_pad * p_pad * oc_pad,
        transcendentals=0,
        bytes_accessed=(n_pad * p_pad + p_pad * oc_pad) * in_item
        + n_pad * oc_pad * itemsize_out,
    )

    if multi_k:
        grid = (oc_pad // tile_oc, n_pad // tile_n, p_pad // tile_k)
        kernel = _lars_kernel_ktiled
        in_specs = [
            pl.BlockSpec((tile_n, tile_k), lambda oc, n, k: (n, k)),
            pl.BlockSpec((tile_k, tile_oc), lambda oc, n, k: (k, oc)),
        ]
        out_specs = pl.BlockSpec((tile_n, tile_oc), lambda oc, n, k: (n, oc))
        scratch = [pltpu.VMEM((tile_n, tile_oc), jnp.float32)]
        dims = ("parallel", "parallel", "arbitrary")
    else:
        grid = (oc_pad // tile_oc, n_pad // tile_n)
        kernel = _lars_kernel
        in_specs = [
            pl.BlockSpec((tile_n, tile_k), lambda oc, n: (n, 0)),
            pl.BlockSpec((tile_k, tile_oc), lambda oc, n: (0, oc)),
        ]
        out_specs = pl.BlockSpec((tile_n, tile_oc), lambda oc, n: (n, oc))
        scratch = []
        dims = ("parallel", "parallel")

    out_packed = pl.pallas_call(
        kernel,
        out_shape=jax.ShapeDtypeStruct((n_pad, oc_pad), out_dtype),
        grid_spec=pltpu.PrefetchScalarGridSpec(
            num_scalar_prefetch=0,
            grid=grid,
            in_specs=in_specs,
            out_specs=out_specs,
            scratch_shapes=scratch,
        ),
        compiler_params=pltpu.CompilerParams(
            dimension_semantics=dims,
            vmem_limit_bytes=vmem_limit,
        ),
        cost_estimate=cost,
    )(X_mm, W_packed)

    # Un-pack: out_packed[n, o*C + c] == recon[n, o, c]; slice/reshape is free
    # when no padding happened (the common case after the minimal-padding fix).
    recon_noc = out_packed[:N, :OC].reshape(N, O, C)
    if output_layout == "noc":
        recon = recon_noc
    else:
        # TODO(synk): the (N,O,C)->(O,N,C) relayout re-reads/re-writes the full
        # reconstruction in HBM; writing (O,N,C) directly from the kernel would
        # force lane-sparse width-d stores for small d, so downstream code that
        # can consume (N,O,C) should request output_layout="noc".
        recon = jnp.transpose(recon_noc, (1, 0, 2))
    return recon, dag_mask, regularizer


if __name__ == "__main__":
    key = jax.random.PRNGKey(0)
    d = 8     # number of variables (self.d)
    n = 300   # number of samples (exercises N padding 300 -> 304 only)
    o = 96    # number of candidate dags (O*C = 768, already 128-aligned)

    kx, kw = jax.random.split(key)
    X = jax.random.normal(kx, (n, d), dtype=jnp.float32)

    # Deterministic synthetic W (normally produced by LARSAlgorithm.fit()):
    # strictly upper-triangular per dag, so (W != 0) looks like a DAG adjacency.
    W_dense = jax.random.normal(kw, (o, d, d), dtype=jnp.float32)
    tri = jnp.triu(jnp.ones((d, d), dtype=jnp.float32), k=1)
    W = W_dense * tri[None, :, :]

    recon, mask, reg = lars_forward(X, W)
    recon = jax.block_until_ready(recon)
    mask = jax.block_until_ready(mask)

    ref = jnp.einsum("np,opc->onc", X, W)
    assert recon.shape == (o, n, d)
    assert jnp.allclose(recon, ref, atol=1e-3, rtol=1e-3), "recon mismatch vs reference"
    assert mask.shape == (o, d, d) and mask.dtype == jnp.bool_
    assert bool(jnp.all(mask == (W != 0))), "mask mismatch vs (W != 0)"
    assert reg == 0.0

    # No-transpose layout option for downstream consumers that accept (N, O, C).
    recon_noc, _, _ = lars_forward(X, W, output_layout="noc")
    recon_noc = jax.block_until_ready(recon_noc)
    assert jnp.allclose(recon_noc, jnp.transpose(ref, (1, 0, 2)), atol=1e-3, rtol=1e-3)

    # Shape exercising OC padding (OC = 400 -> 512) and the un-pad slice.
    o2 = 50
    W2 = jax.random.normal(jax.random.PRNGKey(1), (o2, d, d), dtype=jnp.float32) * tri
    recon2, mask2, _ = lars_forward(X, W2)
    recon2 = jax.block_until_ready(recon2)
    ref2 = jnp.einsum("np,opc->onc", X, W2)
    assert jnp.allclose(recon2, ref2, atol=1e-3, rtol=1e-3)
    assert bool(jnp.all(mask2 == (W2 != 0)))

    print("KERNEL_OK")
</pallas_src>

<mosaic_0001>
module attributes {stable_mosaic.version = 11 : i64} {
  func.func @_lars_kernel(%arg0: i32, %arg1: i32, %arg2: memref<304x8xf32, #tpu.memory_space<vmem>>, %arg3: memref<8x384xf32, #tpu.memory_space<vmem>>, %arg4: memref<304x384xf32, #tpu.memory_space<vmem>>) attributes {dimension_semantics = [#tpu.dimension_semantics<parallel>, #tpu.dimension_semantics<parallel>], iteration_bounds = array<i64: 2, 1>, scalar_prefetch = 0 : i64, scratch_operands = 0 : i64, tpu.core_type = #tpu.core_type<tc>, window_params = [{transform_indices = @transform_0, window_bounds = array<i64: 304, 8>}, {transform_indices = @transform_1, window_bounds = array<i64: 8, 384>}, {transform_indices = @transform_2, window_bounds = array<i64: 304, 384>}]} {
    %c0 = arith.constant 0 : index
    %c0_0 = arith.constant 0 : index
    %0 = vector.load %arg2[%c0, %c0_0] : memref<304x8xf32, #tpu.memory_space<vmem>>, vector<304x8xf32>
    %c0_1 = arith.constant 0 : index
    %c0_2 = arith.constant 0 : index
    %1 = vector.load %arg3[%c0_1, %c0_2] : memref<8x384xf32, #tpu.memory_space<vmem>>, vector<8x384xf32>
    %cst = arith.constant dense<0.000000e+00> : vector<304x384xf32>
    %2 = tpu.matmul %0, %1, %cst {dimension_numbers = #tpu.dot_dimension_numbers<[1], [0], [0], [1], [0, 0, 1, 1], [], []>} : vector<304x8xf32>, vector<8x384xf32>, vector<304x384xf32> -> vector<304x384xf32>
    %c0_3 = arith.constant 0 : index
    %c0_4 = arith.constant 0 : index
    %3 = vector.load %arg4[%c0_3, %c0_4] : memref<304x384xf32, #tpu.memory_space<vmem>>, vector<304x384xf32>
    tpu.vector_store %arg4[%c0_3, %c0_4], %2 {strides = array<i32>} : memref<304x384xf32, #tpu.memory_space<vmem>>, vector<304x384xf32>,
    return
  }
  func.func @transform_0(%arg0: i32, %arg1: i32) -> (i32, i32) {
    %c0_i32 = arith.constant 0 : i32
    %c0_i32_0 = arith.constant 0 : i32
    return %arg1, %c0_i32 : i32, i32
  }
  func.func @transform_1(%arg0: i32, %arg1: i32) -> (i32, i32) {
    %c0_i32 = arith.constant 0 : i32
    %c0_i32_0 = arith.constant 0 : i32
    return %c0_i32, %arg0 : i32, i32
  }
  func.func @transform_2(%arg0: i32, %arg1: i32) -> (i32, i32) {
    %c0_i32 = arith.constant 0 : i32
    return %arg1, %arg0 : i32, i32
  }
}

</mosaic_0001>

<bundles_post_ra>
// kernel: tpu_custom_call.1
= control target key start
LH: loop header
LB: loop body
LE: loop exit
PB: predicated region body
PF: predicated region fallthrough
CT: control target
= control target key end

     0   :  { %7 = vsyncpa [#allocation3], 0  ;;  %s1952_s0 = inlined_call_operand.vmem [shape: f32[304,8], index: 0, kind: input, shape index: {}]   ;;  %s1953_s1 = inlined_call_operand.vmem [shape: f32[8,768], index: 1, kind: input, shape index: {}]   ;;  %s1954_s2 = inlined_call_operand.hbm [shape: f32[304,768], index: 2, kind: output, shape index: {}]  }
   0x1   :  { %9 = vsyncpa [#allocation3 + $0x1], 0  ;;  %s1450_s9 = smov 0   ;;  %s1452_s10 = smov 0  }
   0x2   :  { %s1454_s11 = smov 0   ;;  %s1456_s12 = smov 0  }
   0x3   :  { %s1458_s13 = smov 0   ;;  %s1460_s14 = smov 0  }
   0x4 LB: > { %s1105_s15 = sadd.s32 4294967295, %s1428_s14   ;;  %s1106_s16 = sadd.s32 4294967294, %s1428_s14   ;;  %s1428_s14 = sphi %s1460_s14, %s15_s14   ;;  %s1424_s13 = sphi %s1458_s13, %s1961_s13   ;;  %s1420_s12 = sphi %s1456_s12, %s1960_s12   ;;  %s1416_s11 = sphi %s1454_s11, %s1959_s11   ;;  %s1412_s10 = sphi %s1452_s10, %s1958_s10   ;;  %s1408_s9 = sphi %s1450_s9, %s1957_s9  }
   0x5   : > { %s27_s17 = sadd.s32 1, %s1424_s13  ;;  %s88_s18 = sadd.s32 1, %s1416_s11 }
   0x6   : > { %p29_p0 = scmp.ge.s32.totalorder %s27_s17, 2  ;;  %p98_p1 = scmp.ne.s32.totalorder %s1416_s11, %s1412_s10 }
   0x7   : > { %p99_p2 = scmp.eq.s32.totalorder %s1105_s15, 1  ;;  %p104_p3 = scmp.ne.s32.totalorder %s1412_s10, %s1408_s9 }
   0x8   : > { %s1963_s17 = smov (%p29_p0, %s27_s17), 0  ;;  %p105_p5 = scmp.eq.s32.totalorder %s1106_s16, 1 }
   0x9   : > { %p1490_p4 = por %p99_p2, %p98_p1  ;;  %s84_s20 = ssub.s32 %s1424_s13, %s1963_s17 }
   0xa   : > { %p1110_p6 = scmp.ge.s32.totalorder %s1428_s14, 1  ;;  %p86_p7 = scmp.eq.s32.totalorder %s84_s20, 0 }
   0xb   : > { %p1497_p8 = por %p105_p5, %p104_p3  ;;  %p141_p9 = scmp.lt.s32.totalorder %s1428_s14, 3 }
   0xc   : > { %s1503_s22 = scalar_select %p86_p7, %s1416_s11, %s88_s18  }
   0xd   : > { %p142_p10 = pnand %p1110_p6, %p141_p9 }
   0xe   : > { %s174_s23 = smul.u32 (!%p142_p10), 3, %s1420_s12  ;;  %s165_s4 = sand.u32 (!%p142_p10), 1, %s1412_s10  }
   0xf   : > { %145 = sbr.rel (%p142_p10) target bundleno = 348 (0x15c), region = 28 }
  0x10   : > { %p175_p11 = scmp.lt.s32.totalorder (!%p142_p10), %s174_s23, 5  ;;  %s1292_s5 = smul.u32 (!%p142_p10), 912, %s165_s4 }
  0x11   : > { %s1191_s7 = smul.u32 (!%p142_p10), 384, %s1420_s12  ;;  %s1907_s12 = scalar_lea.sflag (!%p142_p10), [#allocation3], %s165_s4 }
  0x12   : > { %s1780_s6 = scalar_lea.vmem (!%p142_p10), [#allocation2], %s1292_s5 }
  0x13   : > { %s1017_s8 = sshll.u32 (!%p142_p10), %s1780_s6, 4  ;;  %s1899_s18 = scalar_lea.hbm (!%p142_p10), %s1954_s2, %s1191_s7  ;;  %s1901_s8 = int_to_ptr.vmem [resolvable:$true] %s1017_s8 }
  0x14   : > { %v1430_v0 = vmov 0.0   ;;  %s1965_s23 = smov (!%p175_p11, %s174_s23), 5  ;;  %v1514_v1 = vld [vmem:[%s1952_s0] sm:$0xff]  ;;  %vm223_vm0 = vcmask 64512   ;;  %v1519_v4 = vld [vmem:[%s1952_s0 + $0xe8] sm:$0xff]  ;;  %v1532_v7 = vld [vmem:[%s1952_s0 + $0xf0] sm:$0xff] }
  0x15   : > { %402 = vmatprep.mubr.f32.mxu0 %v1430_v0  ;;  %576 = vmatprep.mubr.f32.mxu1 %v1430_v0  ;;  %s1111_s24 = sshll.u32 %s1965_s23, 3  ;;  %v183_v6 = vld [vmem:[%s1952_s0 + $0x8] sm:$0xff]  ;;  %v184_v8 = vld [vmem:[%s1952_s0 + $0x10] sm:$0xff]  ;;  %v1546_v9 = vld [vmem:[%s1952_s0 + $0xf8] sm:$0xff]  ;;  %s1352_s20 = scalar_lea.vmem %s1901_s8, 14592 }
  0x16   : > { %s178_s27 = scalar_lea.vmem %s1953_s1, %s1111_s24  ;;  %v185_v10 = vld [vmem:[%s1952_s0 + $0x18] sm:$0xff]  ;;  %v1559_v11 = vld [vmem:[%s1952_s0 + $0x100] sm:$0xff]  ;;  %v1572_v13 = vld [vmem:[%s1952_s0 + $0x108] sm:$0xff]  ;;  %p1353_p12 = scmp.ne.s32.totalorder %s1901_s8, %s1352_s20 }
  0x17   : > { %v221_v2 = vld [vmem:[%s178_s27 + $0x8] sm:$0xff]  ;;  %v220_v3 = vld [vmem:[%s178_s27] sm:$0xff]  ;;  %v222_v5 = vld [vmem:[%s178_s27 + $0x10] sm:$0xff]  ;;  %s1431_s23 = smov [#allocation2]  }
  0x18   : > { %368 = vmatprep.subr.mxu0 %v221_v2  ;;  %1290 = vmatprep.subr.mxu1 %v221_v2  ;;  %v186_v12 = vld [vmem:[%s1952_s0 + $0x20] sm:$0xff]  ;;  %v187_v14 = vld [vmem:[%s1952_s0 + $0x28] sm:$0xff]  ;;  %v1585_v15 = vld [vmem:[%s1952_s0 + $0x110] sm:$0xff]  ;;  %p1354_p13 = pnand %p1353_p12, %p1490_p4  ;;  %s1356_s24 = sshll.u32 %s1431_s23, 4  ;;  %s1357_s24 = int_to_ptr.vmem [resolvable:$false] %s1356_s24 }
  0x19   : > { %369 = vmatpush1.msra.mxu0 %v220_v3  ;;  %1291 = vmatpush1.msra.mxu1 %v220_v3  ;;  %v188_v16 = vld [vmem:[%s1952_s0 + $0x30] sm:$0xff]  ;;  %v1598_v17 = vld [vmem:[%s1952_s0 + $0x118] sm:$0xff]  ;;  %v1611_v19 = vld [vmem:[%s1952_s0 + $0x120] sm:$0xff]  ;;  %s1358_s25 = scalar_lea.vmem %s1357_s24, 29184  ;;  %p1359_p1 = scmp.lt.s32.totalorder %s1901_s8, %s1357_s24 }
  0x1a   : > { %1112 = vmatmul.mubr.msk.f32.vlgmr.msra.gmra.mxu0 %vm223_vm0, %v1514_v1  ;;  %1141 = vmatmul.mubr.msk.f32.vlgmr.msra.gmra.mxu1 %vm223_vm0, %v1519_v4  ;;  %v189_v18 = vld [vmem:[%s1952_s0 + $0x38] sm:$0xff]  ;;  %v190_v20 = vld [vmem:[%s1952_s0 + $0x40] sm:$0xff]  ;;  %v1624_v21 = vld [vmem:[%s1952_s0 + $0x128] sm:$0xff]  ;;  %p1355_p0 = pneg %p1354_p13  ;;  %p1360_p2 = scmp.lt.s32.totalorder %s1358_s25, %s1352_s20 }
  0x1b   : > { %408 = vmatprep.mubr.f32.mxu0 %v1430_v0  ;;  %1231 = vmatprep.subr.mxu1 %v222_v5  ;;  %v191_v22 = vld [vmem:[%s1952_s0 + $0x48] sm:$0xff]  ;;  %v192_v23 = vld [vmem:[%s1952_s0 + $0x50] sm:$0xff]  ;;  %v193_v24 = vld [vmem:[%s1952_s0 + $0x58] sm:$0xff] }
  0x1c   : > { %1232 = vmatpush3.msra.mxu1 %v222_v5  ;;  %582 = vmatprep.mubr.f32.mxu1 %v1430_v0  ;;  %v194_v25 = vld [vmem:[%s1952_s0 + $0x60] sm:$0xff]  ;;  %v195_v26 = vld [vmem:[%s1952_s0 + $0x68] sm:$0xff]  ;;  %v196_v27 = vld [vmem:[%s1952_s0 + $0x70] sm:$0xff]  ;;  %p1361_p3 = por %p1360_p2, %p1359_p1 }
  0x1d   : > { %v197_v28 = vld [vmem:[%s1952_s0 + $0x78] sm:$0xff]  ;;  %v198_v29 = vld [vmem:[%s1952_s0 + $0x80] sm:$0xff]  ;;  %v199_v30 = vld [vmem:[%s1952_s0 + $0x88] sm:$0xff] }
  0x1e   : > { %1113 = vmatmul.mubr.msk.f32.gmra.mxu0 %vm223_vm0, %v183_v6  ;;  %1142 = vmatmul.mubr.msk.f32.gmra.mxu1 %vm223_vm0, %v1532_v7  ;;  %v200_v31 = vld [vmem:[%s1952_s0 + $0x90] sm:$0xff]  ;;  %v201_v32 = vld [vmem:[%s1952_s0 + $0x98] sm:$0xff]  ;;  %v202_v33 = vld [vmem:[%s1952_s0 + $0xa0] sm:$0xff]  ;;  %p1362_p5 = pnand %p1361_p3, %p1355_p0 }
  0x1f   : > { %414 = vmatprep.mubr.f32.mxu0 %v1430_v0  ;;  %588 = vmatprep.mubr.f32.mxu1 %v1430_v0  ;;  %v203_v34 = vld [vmem:[%s1952_s0 + $0xa8] sm:$0xff]  ;;  %v204_v35 = vld [vmem:[%s1952_s0 + $0xb0] sm:$0xff]  ;;  %v205_v36 = vld [vmem:[%s1952_s0 + $0xb8] sm:$0xff] }
  0x20   : > { %v206_v37 = vld [vmem:[%s1952_s0 + $0xc0] sm:$0xff]  ;;  %v207_v38 = vld [vmem:[%s1952_s0 + $0xc8] sm:$0xff]  ;;  %v208_v39 = vld [vmem:[%s1952_s0 + $0xd0] sm:$0xff] }
  0x21   : > { %v209_v40 = vld [vmem:[%s1952_s0 + $0xd8] sm:$0xff]  ;;  %v210_v41 = vld [vmem:[%s1952_s0 + $0xe0] sm:$0xff] }
  0x22   : > { %1114 = vmatmul.mubr.msk.f32.gmra.mxu0 %vm223_vm0, %v184_v8  ;;  %1143 = vmatmul.mubr.msk.f32.gmra.mxu1 %vm223_vm0, %v1546_v9 }
  0x23   : > { %420 = vmatprep.mubr.f32.mxu0 %v1430_v0  ;;  %594 = vmatprep.mubr.f32.mxu1 %v1430_v0 }
  0x26   : > { %1115 = vmatmul.mubr.msk.f32.gmra.mxu0 %vm223_vm0, %v185_v10  ;;  %1144 = vmatmul.mubr.msk.f32.gmra.mxu1 %vm223_vm0, %v1559_v11 }
  0x27   : > { %426 = vmatprep.mubr.f32.mxu0 %v1430_v0  ;;  %600 = vmatprep.mubr.f32.mxu1 %v1430_v0 }
  0x2a   : > { %1116 = vmatmul.mubr.msk.f32.gmra.mxu0 %vm223_vm0, %v186_v12  ;;  %1145 = vmatmul.mubr.msk.f32.gmra.mxu1 %vm223_vm0, %v1572_v13 }
  0x2b   : > { %432 = vmatprep.mubr.f32.mxu0 %v1430_v0  ;;  %606 = vmatprep.mubr.f32.mxu1 %v1430_v0 }
  0x2e   : > { %1117 = vmatmul.mubr.msk.f32.gmra.mxu0 %vm223_vm0, %v187_v14  ;;  %1146 = vmatmul.mubr.msk.f32.gmra.mxu1 %vm223_vm0, %v1585_v15 }
  0x2f   : > { %438 = vmatprep.mubr.f32.mxu0 %v1430_v0  ;;  %612 = vmatprep.mubr.f32.mxu1 %v1430_v0 }
  0x32   : > { %1118 = vmatmul.mubr.msk.f32.gmra.mxu0 %vm223_vm0, %v188_v16  ;;  %1147 = vmatmul.mubr.msk.f32.gmra.mxu1 %vm223_vm0, %v1598_v17 }
  0x33   : > { %444 = vmatprep.mubr.f32.mxu0 %v1430_v0  ;;  %618 = vmatprep.mubr.f32.mxu1 %v1430_v0 }
  0x36   : > { %1119 = vmatmul.mubr.msk.f32.gmra.mxu0 %vm223_vm0, %v189_v18  ;;  %1148 = vmatmul.mubr.msk.f32.gmra.mxu1 %vm223_vm0, %v1611_v19 }
  0x37   : > { %450 = vmatprep.mubr.f32.mxu0 %v1430_v0  ;;  %624 = vmatprep.mubr.f32.mxu1 %v1430_v0 }
  0x3a   : > { %1120 = vmatmul.mubr.msk.f32.gmra.mxu0 %vm223_vm0, %v190_v20  ;;  %1149 = vmatmul.mubr.msk.f32.gmra.mxu1 %vm223_vm0, %v1624_v21 }
  0x3b   : > { %456 = vmatprep.mubr.f32.mxu0 %v1430_v0  ;;  %1233 = vmatprep.mubr.msk.f32.mxu1 %vm223_vm0, %v1514_v1 }
  0x3e   : > { %1121 = vmatmul.mubr.msk.f32.gmra.mxu0 %vm223_vm0, %v191_v22  ;;  %1234 = vmatmul.mubr.msk.f32.vlgmr.msra.gmra.mxu1 %vm223_vm0, %v183_v6 }
  0x3f   : > { %462 = vmatprep.mubr.f32.mxu0 %v1430_v0  ;;  %1236 = vmatprep.mubr.msk.f32.mxu1 %vm223_vm0, %v184_v8 }
  0x42   : > { %1122 = vmatmul.mubr.msk.f32.gmra.mxu0 %vm223_vm0, %v192_v23  ;;  %1237 = vmatmul.mubr.msk.f32.gmra.mxu1 %vm223_vm0, %v185_v10 }
  0x43   : > { %468 = vmatprep.mubr.f32.mxu0 %v1430_v0  ;;  %1239 = vmatprep.mubr.msk.f32.mxu1 %vm223_vm0, %v186_v12 }
  0x46   : > { %1123 = vmatmul.mubr.msk.f32.gmra.mxu0 %vm223_vm0, %v193_v24  ;;  %1240 = vmatmul.mubr.msk.f32.gmra.mxu1 %vm223_vm0, %v187_v14 }
  0x47   : > { %474 = vmatprep.mubr.f32.mxu0 %v1430_v0  ;;  %1242 = vmatprep.mubr.msk.f32.mxu1 %vm223_vm0, %v188_v16 }
  0x4a   : > { %1124 = vmatmul.mubr.msk.f32.gmra.mxu0 %vm223_vm0, %v194_v25  ;;  %1243 = vmatmul.mubr.msk.f32.gmra.mxu1 %vm223_vm0, %v189_v18 }
  0x4b   : > { %480 = vmatprep.mubr.f32.mxu0 %v1430_v0  ;;  %1245 = vmatprep.mubr.msk.f32.mxu1 %vm223_vm0, %v190_v20 }
  0x4e   : > { %1125 = vmatmul.mubr.msk.f32.gmra.mxu0 %vm223_vm0, %v195_v26  ;;  %1246 = vmatmul.mubr.msk.f32.gmra.mxu1 %vm223_vm0, %v191_v22 }
  0x4f   : > { %486 = vmatprep.mubr.f32.mxu0 %v1430_v0  ;;  %1248 = vmatprep.mubr.msk.f32.mxu1 %vm223_vm0, %v192_v23 }
  0x52   : > { %1126 = vmatmul.mubr.msk.f32.gmra.mxu0 %vm223_vm0, %v196_v27  ;;  %1249 = vmatmul.mubr.msk.f32.gmra.mxu1 %vm223_vm0, %v193_v24 }
  0x53   : > { %492 = vmatprep.mubr.f32.mxu0 %v1430_v0  ;;  %1251 = vmatprep.mubr.msk.f32.mxu1 %vm223_vm0, %v194_v25 }
  0x56   : > { %1127 = vmatmul.mubr.msk.f32.gmra.mxu0 %vm223_vm0, %v197_v28  ;;  %1252 = vmatmul.mubr.msk.f32.gmra.mxu1 %vm223_vm0, %v195_v26 }
  0x57   : > { %498 = vmatprep.mubr.f32.mxu0 %v1430_v0  ;;  %1254 = vmatprep.mubr.msk.f32.mxu1 %vm223_vm0, %v196_v27 }
  0x5a   : > { %1128 = vmatmul.mubr.msk.f32.gmra.mxu0 %vm223_vm0, %v198_v29  ;;  %1255 = vmatmul.mubr.msk.f32.gmra.mxu1 %vm223_vm0, %v197_v28 }
  0x5b   : > { %504 = vmatprep.mubr.f32.mxu0 %v1430_v0  ;;  %1257 = vmatprep.mubr.msk.f32.mxu1 %vm223_vm0, %v198_v29 }
  0x5e   : > { %1129 = vmatmul.mubr.msk.f32.gmra.mxu0 %vm223_vm0, %v199_v30  ;;  %1258 = vmatmul.mubr.msk.f32.gmra.mxu1 %vm223_vm0, %v199_v30 }
  0x5f   : > { %510 = vmatprep.mubr.f32.mxu0 %v1430_v0  ;;  %1260 = vmatprep.mubr.msk.f32.mxu1 %vm223_vm0, %v200_v31 }
  0x62   : > { %1130 = vmatmul.mubr.msk.f32.gmra.mxu0 %vm223_vm0, %v200_v31  ;;  %1261 = vmatmul.mubr.msk.f32.gmra.mxu1 %vm223_vm0, %v201_v32 }
  0x63   : > { %516 = vmatprep.mubr.f32.mxu0 %v1430_v0  ;;  %1263 = vmatprep.mubr.msk.f32.mxu1 %vm223_vm0, %v202_v33 }
  0x66   : > { %1131 = vmatmul.mubr.msk.f32.gmra.mxu0 %vm223_vm0, %v201_v32  ;;  %1264 = vmatmul.mubr.msk.f32.gmra.mxu1 %vm223_vm0, %v203_v34 }
  0x67   : > { %522 = vmatprep.mubr.f32.mxu0 %v1430_v0  ;;  %1266 = vmatprep.mubr.msk.f32.mxu1 %vm223_vm0, %v204_v35 }
  0x6a   : > { %1132 = vmatmul.mubr.msk.f32.gmra.mxu0 %vm223_vm0, %v202_v33  ;;  %1267 = vmatmul.mubr.msk.f32.gmra.mxu1 %vm223_vm0, %v205_v36 }
  0x6b   : > { %528 = vmatprep.mubr.f32.mxu0 %v1430_v0  ;;  %1269 = vmatprep.mubr.msk.f32.mxu1 %vm223_vm0, %v206_v37 }
  0x6e   : > { %1133 = vmatmul.mubr.msk.f32.gmra.mxu0 %vm223_vm0, %v203_v34  ;;  %1270 = vmatmul.mubr.msk.f32.gmra.mxu1 %vm223_vm0, %v207_v38 }
  0x6f   : > { %534 = vmatprep.mubr.f32.mxu0 %v1430_v0  ;;  %1272 = vmatprep.mubr.msk.f32.mxu1 %vm223_vm0, %v208_v39 }
  0x72   : > { %1134 = vmatmul.mubr.msk.f32.gmra.mxu0 %vm223_vm0, %v204_v35  ;;  %1273 = vmatmul.mubr.msk.f32.gmra.mxu1 %vm223_vm0, %v209_v40 }
  0x73   : > { %540 = vmatprep.mubr.f32.mxu0 %v1430_v0  ;;  %1275 = vmatprep.mubr.msk.f32.mxu1 %vm223_vm0, %v210_v41 }
  0x76   : > { %1135 = vmatmul.mubr.msk.f32.gmra.mxu0 %vm223_vm0, %v205_v36  ;;  %1276 = vmatmul.mubr.msk.f32.gmra.mxu1 %vm223_vm0, %v1519_v4 }
  0x77   : > { %546 = vmatprep.mubr.f32.mxu0 %v1430_v0  ;;  %1278 = vmatprep.mubr.msk.f32.mxu1 %vm223_vm0, %v1532_v7 }
  0x7a   : > { %1136 = vmatmul.mubr.msk.f32.gmra.mxu0 %vm223_vm0, %v206_v37  ;;  %1279 = vmatmul.mubr.msk.f32.gmra.mxu1 %vm223_vm0, %v1546_v9 }
  0x7b   : > { %552 = vmatprep.mubr.f32.mxu0 %v1430_v0  ;;  %1281 = vmatprep.mubr.msk.f32.mxu1 %vm223_vm0, %v1559_v11 }
  0x7e   : > { %1137 = vmatmul.mubr.msk.f32.gmra.mxu0 %vm223_vm0, %v207_v38  ;;  %1282 = vmatmul.mubr.msk.f32.gmra.mxu1 %vm223_vm0, %v1572_v13 }
  0x7f   : > { %558 = vmatprep.mubr.f32.mxu0 %v1430_v0  ;;  %1284 = vmatprep.mubr.msk.f32.mxu1 %vm223_vm0, %v1585_v15 }
  0x82   : > { %1138 = vmatmul.mubr.msk.f32.gmra.mxu0 %vm223_vm0, %v208_v39  ;;  %1285 = vmatmul.mubr.msk.f32.gmra.mxu1 %vm223_vm0, %v1598_v17 }
  0x83   : > { %564 = vmatprep.mubr.f32.mxu0 %v1430_v0  ;;  %1287 = vmatprep.mubr.msk.f32.mxu1 %vm223_vm0, %v1611_v19 }
  0x86   : > { %1139 = vmatmul.mubr.msk.f32.gmra.mxu0 %vm223_vm0, %v209_v40  ;;  %1288 = vmatmul.mubr.msk.f32.gmra.mxu1 %vm223_vm0, %v1624_v21 }
  0x87   : > { %570 = vmatprep.mubr.f32.mxu0 %v1430_v0 }
  0x8a   : > { %1140 = vmatmul.mubr.msk.f32.gmra.mxu0 %vm223_vm0, %v210_v41 }
  0xda   : > { %v404_v42 = vpop.f32.mrf.mxu0  ;;  %v578_v43 = vpop.f32.mrf.mxu1 }
  0xdb   : > { %886 = vst [vmem:[%s1780_s6] sm:$0xff] %v404_v42  ;;  %973 = vst [vmem:[%s1780_s6 + $0x2b8] sm:$0xff] %v578_v43 }
  0xdc   : > { %v406_v44 = vpop.f32.mrf.mxu0  ;;  %v580_v45 = vpop.f32.mrf.mxu1 }
  0xdd   : > { %887 = vst [vmem:[%s1780_s6 + $0x8] sm:$0xff] %v406_v44  ;;  %974 = vst [vmem:[%s1780_s6 + $0x2c0] sm:$0xff] %v580_v45 }
  0xde   : > { %v410_v46 = vpop.f32.mrf.mxu0  ;;  %v584_v47 = vpop.f32.mrf.mxu1 }
  0xdf   : > { %889 = vst [vmem:[%s1780_s6 + $0x18] sm:$0xff] %v410_v46  ;;  %976 = vst [vmem:[%s1780_s6 + $0x2d0] sm:$0xff] %v584_v47 }
  0xe0   : > { %v412_v48 = vpop.f32.mrf.mxu0  ;;  %v586_v49 = vpop.f32.mrf.mxu1 }
  0xe1   : > { %890 = vst [vmem:[%s1780_s6 + $0x20] sm:$0xff] %v412_v48  ;;  %977 = vst [vmem:[%s1780_s6 + $0x2d8] sm:$0xff] %v586_v49 }
  0xe2   : > { %v416_v50 = vpop.f32.mrf.mxu0  ;;  %v590_v51 = vpop.f32.mrf.mxu1 }
  0xe3   : > { %892 = vst [vmem:[%s1780_s6 + $0x30] sm:$0xff] %v416_v50  ;;  %979 = vst [vmem:[%s1780_s6 + $0x2e8] sm:$0xff] %v590_v51 }
  0xe4   : > { %v418_v52 = vpop.f32.mrf.mxu0  ;;  %v592_v53 = vpop.f32.mrf.mxu1 }
  0xe5   : > { %893 = vst [vmem:[%s1780_s6 + $0x38] sm:$0xff] %v418_v52  ;;  %980 = vst [vmem:[%s1780_s6 + $0x2f0] sm:$0xff] %v592_v53 }
  0xe6   : > { %v422_v54 = vpop.f32.mrf.mxu0  ;;  %v596_v55 = vpop.f32.mrf.mxu1 }
  0xe7   : > { %895 = vst [vmem:[%s1780_s6 + $0x48] sm:$0xff] %v422_v54  ;;  %982 = vst [vmem:[%s1780_s6 + $0x300] sm:$0xff] %v596_v55 }
  0xe8   : > { %v424_v56 = vpop.f32.mrf.mxu0  ;;  %v598_v57 = vpop.f32.mrf.mxu1 }
  0xe9   : > { %896 = vst [vmem:[%s1780_s6 + $0x50] sm:$0xff] %v424_v56  ;;  %983 = vst [vmem:[%s1780_s6 + $0x308] sm:$0xff] %v598_v57 }
  0xea   : > { %v428_v58 = vpop.f32.mrf.mxu0  ;;  %v602_v59 = vpop.f32.mrf.mxu1 }
  0xeb   : > { %898 = vst [vmem:[%s1780_s6 + $0x60] sm:$0xff] %v428_v58  ;;  %985 = vst [vmem:[%s1780_s6 + $0x318] sm:$0xff] %v602_v59 }
  0xec   : > { %v430_v60 = vpop.f32.mrf.mxu0  ;;  %v604_v61 = vpop.f32.mrf.mxu1 }
  0xed   : > { %899 = vst [vmem:[%s1780_s6 + $0x68] sm:$0xff] %v430_v60  ;;  %986 = vst [vmem:[%s1780_s6 + $0x320] sm:$0xff] %v604_v61 }
  0xee   : > { %v434_v62 = vpop.f32.mrf.mxu0  ;;  %v608_v63 = vpop.f32.mrf.mxu1 }
  0xef   : > { %901 = vst [vmem:[%s1780_s6 + $0x78] sm:$0xff] %v434_v62  ;;  %988 = vst [vmem:[%s1780_s6 + $0x330] sm:$0xff] %v608_v63 }
  0xf0   : > { %v436_v0 = vpop.f32.mrf.mxu0  ;;  %v610_v1 = vpop.f32.mrf.mxu1 }
  0xf1   : > { %902 = vst [vmem:[%s1780_s6 + $0x80] sm:$0xff] %v436_v0  ;;  %989 = vst [vmem:[%s1780_s6 + $0x338] sm:$0xff] %v610_v1 }
  0xf2   : > { %v440_v2 = vpop.f32.mrf.mxu0  ;;  %v614_v3 = vpop.f32.mrf.mxu1 }
  0xf3   : > { %904 = vst [vmem:[%s1780_s6 + $0x90] sm:$0xff] %v440_v2  ;;  %991 = vst [vmem:[%s1780_s6 + $0x348] sm:$0xff] %v614_v3 }
  0xf4   : > { %v442_v4 = vpop.f32.mrf.mxu0  ;;  %v616_v5 = vpop.f32.mrf.mxu1 }
  0xf5   : > { %905 = vst [vmem:[%s1780_s6 + $0x98] sm:$0xff] %v442_v4  ;;  %992 = vst [vmem:[%s1780_s6 + $0x350] sm:$0xff] %v616_v5 }
  0xf6   : > { %v446_v6 = vpop.f32.mrf.mxu0  ;;  %v620_v7 = vpop.f32.mrf.mxu1 }
  0xf7   : > { %907 = vst [vmem:[%s1780_s6 + $0xa8] sm:$0xff] %v446_v6  ;;  %994 = vst [vmem:[%s1780_s6 + $0x360] sm:$0xff] %v620_v7 }
  0xf8   : > { %v448_v8 = vpop.f32.mrf.mxu0  ;;  %v622_v9 = vpop.f32.mrf.mxu1 }
  0xf9   : > { %908 = vst [vmem:[%s1780_s6 + $0xb0] sm:$0xff] %v448_v8  ;;  %995 = vst [vmem:[%s1780_s6 + $0x368] sm:$0xff] %v622_v9 }
  0xfa   : > { %v452_v10 = vpop.f32.mrf.mxu0  ;;  %v626_v11 = vpop.f32.mrf.mxu1 }
  0xfb   : > { %910 = vst [vmem:[%s1780_s6 + $0xc0] sm:$0xff] %v452_v10  ;;  %997 = vst [vmem:[%s1780_s6 + $0x378] sm:$0xff] %v626_v11 }
  0xfc   : > { %v454_v12 = vpop.f32.mrf.mxu0  ;;  %v628_v13 = vpop.f32.mrf.mxu1 }
  0xfd   : > { %911 = vst [vmem:[%s1780_s6 + $0xc8] sm:$0xff] %v454_v12  ;;  %998 = vst [vmem:[%s1780_s6 + $0x380] sm:$0xff] %v628_v13 }
  0xfe   : > { %v458_v14 = vpop.f32.mrf.mxu0  ;;  %v1235_v15 = vpop.f32.mrf.mxu1 }
  0xff   : > { %913 = vst [vmem:[%s1780_s6 + $0xd8] sm:$0xff] %v458_v14  ;;  %891 = vst [vmem:[%s1780_s6 + $0x28] sm:$0xff] %v1235_v15 }
 0x100   : > { %v460_v16 = vpop.f32.mrf.mxu0  ;;  %v697_v17 = vpop.f32.mrf.mxu1 }
 0x101   : > { %914 = vst [vmem:[%s1780_s6 + $0xe0] sm:$0xff] %v460_v16  ;;  %888 = vst [vmem:[%s1780_s6 + $0x10] sm:$0xff] %v697_v17 }
 0x102   : > { %v464_v18 = vpop.f32.mrf.mxu0  ;;  %v1238_v19 = vpop.f32.mrf.mxu1 }
 0x103   : > { %916 = vst [vmem:[%s1780_s6 + $0xf0] sm:$0xff] %v464_v18  ;;  %897 = vst [vmem:[%s1780_s6 + $0x58] sm:$0xff] %v1238_v19 }
 0x104   : > { %v466_v20 = vpop.f32.mrf.mxu0  ;;  %v707_v21 = vpop.f32.mrf.mxu1 }
 0x105   : > { %917 = vst [vmem:[%s1780_s6 + $0xf8] sm:$0xff] %v466_v20  ;;  %894 = vst [vmem:[%s1780_s6 + $0x40] sm:$0xff] %v707_v21 }
 0x106   : > { %v470_v22 = vpop.f32.mrf.mxu0  ;;  %v1241_v23 = vpop.f32.mrf.mxu1 }
 0x107   : > { %919 = vst [vmem:[%s1780_s6 + $0x108] sm:$0xff] %v470_v22  ;;  %903 = vst [vmem:[%s1780_s6 + $0x88] sm:$0xff] %v1241_v23 }
 0x108   : > { %v472_v24 = vpop.f32.mrf.mxu0  ;;  %v717_v25 = vpop.f32.mrf.mxu1 }
 0x109   : > { %920 = vst [vmem:[%s1780_s6 + $0x110] sm:$0xff] %v472_v24  ;;  %900 = vst [vmem:[%s1780_s6 + $0x70] sm:$0xff] %v717_v25 }
 0x10a   : > { %v476_v26 = vpop.f32.mrf.mxu0  ;;  %v1244_v27 = vpop.f32.mrf.mxu1 }
 0x10b   : > { %922 = vst [vmem:[%s1780_s6 + $0x120] sm:$0xff] %v476_v26  ;;  %909 = vst [vmem:[%s1780_s6 + $0xb8] sm:$0xff] %v1244_v27 }
 0x10c   : > { %v478_v28 = vpop.f32.mrf.mxu0  ;;  %v727_v29 = vpop.f32.mrf.mxu1 }
 0x10d   : > { %923 = vst [vmem:[%s1780_s6 + $0x128] sm:$0xff] %v478_v28  ;;  %906 = vst [vmem:[%s1780_s6 + $0xa0] sm:$0xff] %v727_v29 }
 0x10e   : > { %v482_v30 = vpop.f32.mrf.mxu0  ;;  %v1247_v31 = vpop.f32.mrf.mxu1 }
 0x10f   : > { %925 = vst [vmem:[%s1780_s6 + $0x138] sm:$0xff] %v482_v30  ;;  %915 = vst [vmem:[%s1780_s6 + $0xe8] sm:$0xff] %v1247_v31 }
 0x110   : > { %v484_v32 = vpop.f32.mrf.mxu0  ;;  %v737_v33 = vpop.f32.mrf.mxu1 }
 0x111   : > { %926 = vst [vmem:[%s1780_s6 + $0x140] sm:$0xff] %v484_v32  ;;  %912 = vst [vmem:[%s1780_s6 + $0xd0] sm:$0xff] %v737_v33 }
 0x112   : > { %v488_v34 = vpop.f32.mrf.mxu0  ;;  %v1250_v35 = vpop.f32.mrf.mxu1 }
 0x113   : > { %928 = vst [vmem:[%s1780_s6 + $0x150] sm:$0xff] %v488_v34  ;;  %921 = vst [vmem:[%s1780_s6 + $0x118] sm:$0xff] %v1250_v35 }
 0x114   : > { %v490_v36 = vpop.f32.mrf.mxu0  ;;  %v747_v37 = vpop.f32.mrf.mxu1 }
 0x115   : > { %929 = vst [vmem:[%s1780_s6 + $0x158] sm:$0xff] %v490_v36  ;;  %918 = vst [vmem:[%s1780_s6 + $0x100] sm:$0xff] %v747_v37 }
 0x116   : > { %v494_v38 = vpop.f32.mrf.mxu0  ;;  %v1253_v39 = vpop.f32.mrf.mxu1 }
 0x117   : > { %931 = vst [vmem:[%s1780_s6 + $0x168] sm:$0xff] %v494_v38  ;;  %927 = vst [vmem:[%s1780_s6 + $0x148] sm:$0xff] %v1253_v39 }
 0x118   : > { %v496_v40 = vpop.f32.mrf.mxu0  ;;  %v757_v41 = vpop.f32.mrf.mxu1 }
 0x119   : > { %932 = vst [vmem:[%s1780_s6 + $0x170] sm:$0xff] %v496_v40  ;;  %924 = vst [vmem:[%s1780_s6 + $0x130] sm:$0xff] %v757_v41 }
 0x11a   : > { %v500_v42 = vpop.f32.mrf.mxu0  ;;  %v1256_v43 = vpop.f32.mrf.mxu1 }
 0x11b   : > { %934 = vst [vmem:[%s1780_s6 + $0x180] sm:$0xff] %v500_v42  ;;  %933 = vst [vmem:[%s1780_s6 + $0x178] sm:$0xff] %v1256_v43 }
 0x11c   : > { %v502_v44 = vpop.f32.mrf.mxu0  ;;  %v767_v45 = vpop.f32.mrf.mxu1 }
 0x11d   : > { %935 = vst [vmem:[%s1780_s6 + $0x188] sm:$0xff] %v502_v44  ;;  %930 = vst [vmem:[%s1780_s6 + $0x160] sm:$0xff] %v767_v45 }
 0x11e   : > { %v506_v46 = vpop.f32.mrf.mxu0  ;;  %v1259_v47 = vpop.f32.mrf.mxu1 }
 0x11f   : > { %937 = vst [vmem:[%s1780_s6 + $0x198] sm:$0xff] %v506_v46  ;;  %939 = vst [vmem:[%s1780_s6 + $0x1a8] sm:$0xff] %v1259_v47 }
 0x120   : > { %v508_v48 = vpop.f32.mrf.mxu0  ;;  %v777_v49 = vpop.f32.mrf.mxu1 }
 0x121   : > { %938 = vst [vmem:[%s1780_s6 + $0x1a0] sm:$0xff] %v508_v48  ;;  %936 = vst [vmem:[%s1780_s6 + $0x190] sm:$0xff] %v777_v49 }
 0x122   : > { %v512_v50 = vpop.f32.mrf.mxu0  ;;  %v1262_v51 = vpop.f32.mrf.mxu1 }
 0x123   : > { %940 = vst [vmem:[%s1780_s6 + $0x1b0] sm:$0xff] %v512_v50  ;;  %945 = vst [vmem:[%s1780_s6 + $0x1d8] sm:$0xff] %v1262_v51 }
 0x124   : > { %v514_v52 = vpop.f32.mrf.mxu0  ;;  %v787_v53 = vpop.f32.mrf.mxu1 }
 0x125   : > { %941 = vst [vmem:[%s1780_s6 + $0x1b8] sm:$0xff] %v514_v52  ;;  %942 = vst [vmem:[%s1780_s6 + $0x1c0] sm:$0xff] %v787_v53 }
 0x126   : > { %v518_v54 = vpop.f32.mrf.mxu0  ;;  %v1265_v55 = vpop.f32.mrf.mxu1 }
 0x127   : > { %943 = vst [vmem:[%s1780_s6 + $0x1c8] sm:$0xff] %v518_v54  ;;  %951 = vst [vmem:[%s1780_s6 + $0x208] sm:$0xff] %v1265_v55 }
 0x128   : > { %v520_v56 = vpop.f32.mrf.mxu0  ;;  %v797_v57 = vpop.f32.mrf.mxu1 }
 0x129   : > { %944 = vst [vmem:[%s1780_s6 + $0x1d0] sm:$0xff] %v520_v56  ;;  %948 = vst [vmem:[%s1780_s6 + $0x1f0] sm:$0xff] %v797_v57 }
 0x12a   : > { %v524_v58 = vpop.f32.mrf.mxu0  ;;  %v1268_v59 = vpop.f32.mrf.mxu1 }
 0x12b   : > { %946 = vst [vmem:[%s1780_s6 + $0x1e0] sm:$0xff] %v524_v58  ;;  %957 = vst [vmem:[%s1780_s6 + $0x238] sm:$0xff] %v1268_v59 }
 0x12c   : > { %v526_v60 = vpop.f32.mrf.mxu0  ;;  %v807_v61 = vpop.f32.mrf.mxu1 }
 0x12d   : > { %947 = vst [vmem:[%s1780_s6 + $0x1e8] sm:$0xff] %v526_v60  ;;  %954 = vst [vmem:[%s1780_s6 + $0x220] sm:$0xff] %v807_v61 }
 0x12e   : > { %v530_v62 = vpop.f32.mrf.mxu0  ;;  %v1271_v63 = vpop.f32.mrf.mxu1 }
 0x12f   : > { %949 = vst [vmem:[%s1780_s6 + $0x1f8] sm:$0xff] %v530_v62  ;;  %963 = vst [vmem:[%s1780_s6 + $0x268] sm:$0xff] %v1271_v63 }
 0x130   : > { %v532_v0 = vpop.f32.mrf.mxu0  ;;  %v817_v1 = vpop.f32.mrf.mxu1 }
 0x131   : > { %950 = vst [vmem:[%s1780_s6 + $0x200] sm:$0xff] %v532_v0  ;;  %960 = vst [vmem:[%s1780_s6 + $0x250] sm:$0xff] %v817_v1 }
 0x132   : > { %v536_v2 = vpop.f32.mrf.mxu0  ;;  %v1274_v3 = vpop.f32.mrf.mxu1 }
 0x133   : > { %952 = vst [vmem:[%s1780_s6 + $0x210] sm:$0xff] %v536_v2  ;;  %969 = vst [vmem:[%s1780_s6 + $0x298] sm:$0xff] %v1274_v3 }
 0x134   : > { %v538_v4 = vpop.f32.mrf.mxu0  ;;  %v827_v5 = vpop.f32.mrf.mxu1 }
 0x135   : > { %953 = vst [vmem:[%s1780_s6 + $0x218] sm:$0xff] %v538_v4  ;;  %966 = vst [vmem:[%s1780_s6 + $0x280] sm:$0xff] %v827_v5 }
 0x136   : > { %v542_v6 = vpop.f32.mrf.mxu0  ;;  %v1277_v7 = vpop.f32.mrf.mxu1 }
 0x137   : > { %955 = vst [vmem:[%s1780_s6 + $0x228] sm:$0xff] %v542_v6  ;;  %975 = vst [vmem:[%s1780_s6 + $0x2c8] sm:$0xff] %v1277_v7 }
 0x138   : > { %v544_v8 = vpop.f32.mrf.mxu0  ;;  %v837_v9 = vpop.f32.mrf.mxu1 }
 0x139   : > { %956 = vst [vmem:[%s1780_s6 + $0x230] sm:$0xff] %v544_v8  ;;  %972 = vst [vmem:[%s1780_s6 + $0x2b0] sm:$0xff] %v837_v9 }
 0x13a   : > { %v548_v10 = vpop.f32.mrf.mxu0  ;;  %v1280_v11 = vpop.f32.mrf.mxu1 }
 0x13b   : > { %958 = vst [vmem:[%s1780_s6 + $0x240] sm:$0xff] %v548_v10  ;;  %981 = vst [vmem:[%s1780_s6 + $0x2f8] sm:$0xff] %v1280_v11 }
 0x13c   : > { %v550_v12 = vpop.f32.mrf.mxu0  ;;  %v847_v13 = vpop.f32.mrf.mxu1 }
 0x13d   : > { %959 = vst [vmem:[%s1780_s6 + $0x248] sm:$0xff] %v550_v12  ;;  %978 = vst [vmem:[%s1780_s6 + $0x2e0] sm:$0xff] %v847_v13 }
 0x13e   : > { %v554_v14 = vpop.f32.mrf.mxu0  ;;  %v1283_v15 = vpop.f32.mrf.mxu1 }
 0x13f   : > { %961 = vst [vmem:[%s1780_s6 + $0x258] sm:$0xff] %v554_v14  ;;  %987 = vst [vmem:[%s1780_s6 + $0x328] sm:$0xff] %v1283_v15 }
 0x140   : > { %v556_v16 = vpop.f32.mrf.mxu0  ;;  %v857_v17 = vpop.f32.mrf.mxu1 }
 0x141   : > { %962 = vst [vmem:[%s1780_s6 + $0x260] sm:$0xff] %v556_v16  ;;  %984 = vst [vmem:[%s1780_s6 + $0x310] sm:$0xff] %v857_v17 }
 0x142   : > { %v560_v18 = vpop.f32.mrf.mxu0  ;;  %v1286_v19 = vpop.f32.mrf.mxu1 }
 0x143   : > { %964 = vst [vmem:[%s1780_s6 + $0x270] sm:$0xff] %v560_v18  ;;  %993 = vst [vmem:[%s1780_s6 + $0x358] sm:$0xff] %v1286_v19 }
 0x144   : > { %v562_v20 = vpop.f32.mrf.mxu0  ;;  %v867_v21 = vpop.f32.mrf.mxu1 }
 0x145   : > { %965 = vst [vmem:[%s1780_s6 + $0x278] sm:$0xff] %v562_v20  ;;  %990 = vst [vmem:[%s1780_s6 + $0x340] sm:$0xff] %v867_v21 }
 0x146   : > { %v566_v22 = vpop.f32.mrf.mxu0  ;;  %v1289_v23 = vpop.f32.mrf.mxu1 }
 0x147   : > { %967 = vst [vmem:[%s1780_s6 + $0x288] sm:$0xff] %v566_v22  ;;  %999 = vst [vmem:[%s1780_s6 + $0x388] sm:$0xff] %v1289_v23 }
 0x148   : > { %v568_v24 = vpop.f32.mrf.mxu0  ;;  %v877_v25 = vpop.f32.mrf.mxu1 }
 0x149   : > { %968 = vst [vmem:[%s1780_s6 + $0x290] sm:$0xff] %v568_v24  ;;  %996 = vst [vmem:[%s1780_s6 + $0x370] sm:$0xff] %v877_v25 }
 0x14a   : > { %v572_v26 = vpop.f32.mrf.mxu0 }
 0x14b   : > { %970 = vst [vmem:[%s1780_s6 + $0x2a0] sm:$0xff] %v572_v26 }
 0x14c   : > { %v574_v27 = vpop.f32.mrf.mxu0 }
 0x14d   : > { %971 = vst [vmem:[%s1780_s6 + $0x2a8] sm:$0xff] %v574_v27 }
 0x14e   : > { %1365 = shalt.err (!%p1362_p5)
}
 0x14f   : > { %s1366_s26 = scalar_lea.hbm %s1899_s18, 14592  ;;  %s1370_s29 = scalar_lea.hbm %s1954_s2, 29184 }
 0x150   : > { %p1367_p6 = scmp.ne.s32.totalorder %s1899_s18, %s1366_s26  ;;  %p1371_p10 = scmp.lt.s32.totalorder %s1899_s18, %s1954_s2 }
 0x151   : > { %p1372_p11 = scmp.lt.s32.totalorder %s1370_s29, %s1366_s26 }
 0x152   : > { %p1368_p7 = pnand %p1367_p6, %p1490_p4 }
 0x153   : > { %p1373_p12 = por %p1372_p11, %p1371_p10 }
 0x154   : > { %p1369_p9 = pneg %p1368_p7 }
 0x156   : > { %p1374_p13 = pnand %p1373_p12, %p1369_p9 }
 0x158   : > { %1377 = shalt.err (!%p1374_p13)
}
 0x159   : > { %s1432_s4 = smov 384   ;;  %s1433_s5 = smov 768  }
 0x15a   : > { %s1434_s6 = smov 24  }
 0x15b   : > { %1293 = dma.vmem_to_hbm [thread:$0]  (%p1490_p4), %s1901_s8, 14592, %s1899_s18, %s1907_s12, %s1432_s4, %s1433_s5, %s1434_s6  }
 0x15c PF: > { %p1299_p0 = scmp.ge.s32.totalorder %s1428_s14, 2  ;;  %s1032_s7 = sand.u32 1, %s1408_s9  }
 0x15d   : > { %s1033_s15 = scalar_lea.sflag [#allocation3], %s1032_s7 }
 0x15e   : > { %p1296_p1 = pnand %p1299_p0, %p1497_p8 }
 0x160   : > { %p1297_p2 = pneg %p1296_p1 }
 0x162   : > { %1403 = dma.done.wait (%p1297_p2), %s1033_s15, 14592  }
 0x163   : > { %1405 = vsyncadd (%p1297_p2), %s1033_s15, 4294952704  ;;  %s15_s14 = sadd.s32 1, %s1428_s14   ;;  %s1957_s9 = smov %s1412_s10 }
 0x164   : > { %p12_p3 = scmp.ge.s32.totalorder %s15_s14, 4   ;;  %s1958_s10 = smov %s1416_s11 }
 0x165   : > { %s1959_s11 = smov %s1503_s22  ;;  %s1960_s12 = smov %s1424_s13 }
 0x166   : > { %s1961_s13 = smov %s1963_s17  ;;  %14 = sbr.rel (!%p12_p3) target bundleno = 4 (0x4), region = 66 }
 0x16b   :  { %1038 = vsyncpa [#allocation3], 1 }
 0x16c   :  { %1040 = vsyncpa [#allocation3 + $0x1], 1 }

</bundles_post_ra>
